<compile_context>
chip_gen: v5e
topology: v5e:2x2
jax: 0.10.0
libtpu: 0.0.40
codegen_flags: <defaults>
</compile_context>

<pallas_src>
import functools

import jax
import jax.numpy as jnp
from jax.experimental import pallas as pl
from jax.experimental.pallas import tpu as pltpu


# ---------------------------------------------------------------------------
# Hahn recurrence (trace-time Python coefficients, division folded into 1/A).
# ---------------------------------------------------------------------------
def _hahn_AC(n, alpha, beta, N):
    A = ((n + alpha + 1.0) * (n + alpha + beta + 1.0) * (N - n)) / (
        (2.0 * n + alpha + beta + 1.0) * (2.0 * n + alpha + beta + 2.0))
    C = (n * (n + alpha + beta + N + 1.0) * (n + beta)) / (
        (2.0 * n + alpha + beta) * (2.0 * n + alpha + beta + 1.0))
    return A, C


def _hahn_terms(t, degree, alpha, beta, N):
    """Yield Q_0..Q_degree evaluated elementwise on t (any shape)."""
    q_prev = jnp.ones_like(t)
    yield q_prev
    if degree == 0:
        return
    c1 = (alpha + beta + 2.0) / ((alpha + 1.0) * N)
    q_curr = 1.0 - c1 * t
    yield q_curr
    for n in range(1, degree):
        A, C = _hahn_AC(float(n), alpha, beta, N)
        inv_a = 1.0 / A
        q_next = (((A + C) * inv_a) - inv_a * t) * q_curr - (C * inv_a) * q_prev
        q_prev, q_curr = q_curr, q_next
        yield q_next


# ---------------------------------------------------------------------------
# Fused HPKAN kernel: one grid step processes `tb` batch elements.
# ---------------------------------------------------------------------------
def _hpkan_kernel(x_ref, w1_ref, w2_ref, o_ref, lhs_ref, t2w_ref, rhs_ref, *,
                  degree, alpha, beta, N, tb, L, D):
    rows = L * tb

    # ---- intrapatch mix: contract the feature axis D ------------------------
    x = x_ref[...].astype(jnp.float32).reshape(rows, D)     # (L, tb, D) -> (L*tb, D)
    t = jnp.tanh(x)
    for k, q in enumerate(_hahn_terms(t, degree, alpha, beta, N)):
        lhs_ref[:, k * D:(k + 1) * D] = q.astype(jnp.bfloat16)
    # one wide-K MXU push: (L*tb, (deg+1)*D) @ ((deg+1)*D, D) -> (L*tb, D)
    y = jnp.dot(lhs_ref[...], w1_ref[...], preferred_element_type=jnp.float32)

    # ---- interpatch mix: contract the sequence axis L ------------------------
    # Fold batch onto lanes ONCE, then build the whole RHS with full-width
    # stores and issue a single (L, (deg+1)*L) @ ((deg+1)*L, tb*D) matmul.
    t2 = jnp.tanh(y).reshape(L, tb, D)
    for b in range(tb):
        t2w_ref[:, b * D:(b + 1) * D] = t2[:, b, :]
    t2w = t2w_ref[...]                                       # (L, tb*D)
    for k, q in enumerate(_hahn_terms(t2w, degree, alpha, beta, N)):
        rhs_ref[k * L:(k + 1) * L, :] = q.astype(jnp.bfloat16)
    z = jnp.dot(w2_ref[...], rhs_ref[...], preferred_element_type=jnp.float32)

    # One lane-dense store of the whole tile; z[o, b*D+d] == out[b, o, d].
    o_ref[...] = z.astype(o_ref.dtype)


def _pick_tb(B, L, D, target_elems=128 * 1024):
    """Largest batch tile tb (divisor of B) with tb*L*D <= target_elems.

    Block legality: tb == B (full dim) or (tb % 8 == 0 and (tb*D) % 128 == 0).
    No forced >=2 grid steps (pure overhead on single-TC v5e/v6e).
    """
    valid = [tb for tb in range(1, B + 1)
             if B % tb == 0 and (tb == B or (tb % 8 == 0 and (tb * D) % 128 == 0))]
    fitting = [tb for tb in valid if tb * L * D <= target_elems]
    return max(fitting) if fitting else min(valid)


def hpkan_forward(x, intra_coeffs, inter_coeffs, *, degree=3, alpha=1.0,
                  beta=1.0, N=7.0, tb=None):
    """HPKAN forward: intrapatch Hahn-KAN over D, then interpatch Hahn-KAN over L."""
    B, L, D = x.shape
    assert intra_coeffs.shape == (D, D, degree + 1)
    assert inter_coeffs.shape == (L, L, degree + 1)
    if tb is None:
        tb = _pick_tb(B, L, D)
    assert B % tb == 0

    # One-time weight prep (fused under the surrounding jit):
    #   w1[k*D + i, o] = intra_coeffs[i, o, k]   (intrapatch matmul RHS)
    #   w2[o, k*L + l] = inter_coeffs[l, o, k]   (interpatch matmul LHS)
    w1 = jnp.transpose(intra_coeffs, (2, 0, 1)) \
        .reshape((degree + 1) * D, D).astype(jnp.bfloat16)
    w2 = jnp.transpose(inter_coeffs, (1, 2, 0)) \
        .reshape(L, (degree + 1) * L).astype(jnp.bfloat16)

    # Present x sequence-major so kernel rows are (l, b)-major; output comes
    # back as a lane-dense (L, B*D) slab (wrapper reshape/transpose = plumbing).
    x_t = jnp.transpose(x, (1, 0, 2))                        # (L, B, D)

    kernel = functools.partial(
        _hpkan_kernel, degree=degree, alpha=float(alpha), beta=float(beta),
        N=float(N), tb=tb, L=L, D=D)

    cost = pl.CostEstimate(
        flops=2 * B * L * (degree + 1) * D * (D + L),
        transcendentals=2 * B * L * D,
        bytes_accessed=2 * B * L * D * x.dtype.itemsize
        + ((degree + 1) * D * D + (degree + 1) * L * L) * 2)

    out2d = pl.pallas_call(
        kernel,
        out_shape=jax.ShapeDtypeStruct((L, B * D), x.dtype),
        grid=(B // tb,),
        in_specs=[
            pl.BlockSpec((L, tb, D), lambda i: (0, i, 0)),
            pl.BlockSpec(((degree + 1) * D, D), lambda i: (0, 0)),
            pl.BlockSpec((L, (degree + 1) * L), lambda i: (0, 0)),
        ],
        out_specs=pl.BlockSpec((L, tb * D), lambda i: (0, i)),
        scratch_shapes=[
            pltpu.VMEM((L * tb, (degree + 1) * D), jnp.bfloat16),   # intrapatch LHS
            pltpu.VMEM((L, tb * D), jnp.float32),                   # batch-folded tanh(y)
            pltpu.VMEM(((degree + 1) * L, tb * D), jnp.bfloat16),   # interpatch RHS
        ],
        compiler_params=pltpu.CompilerParams(
            dimension_semantics=("parallel",),
            # No vmem_limit_bytes override: blocks fit the scoped default on
            # every generation (incl. v7x's 64 MiB-total VMEM).
        ),
        cost_estimate=cost,
    )(x_t, w1, w2)

    # out2d[o, b*D + d] == HPKAN(x)[b, o, d]
    return jnp.transpose(out2d.reshape(L, B, D), (1, 0, 2))


# ---------------------------------------------------------------------------
# Pure-JAX f32 reference (correctness check only)
# ---------------------------------------------------------------------------
def _hahn_kan_ref(x2d, coeffs, *, degree, alpha, beta, N):
    t = jnp.tanh(x2d.astype(jnp.float32))
    Bm = jnp.stack(list(_hahn_terms(t, degree, alpha, beta, N)), axis=-1)
    return jnp.einsum("bid,iod->bo", Bm, coeffs)


def _hpkan_ref(x, intra_coeffs, inter_coeffs, *, degree, alpha, beta, N):
    B, L, D = x.shape
    y = _hahn_kan_ref(x.reshape(B * L, D), intra_coeffs,
                      degree=degree, alpha=alpha, beta=beta, N=N).reshape(B, L, D)
    yp = jnp.transpose(y, (0, 2, 1))
    z = _hahn_kan_ref(yp.reshape(B * D, L), inter_coeffs,
                      degree=degree, alpha=alpha, beta=beta, N=N).reshape(B, D, L)
    return jnp.transpose(z, (0, 2, 1))


if __name__ == "__main__":
    # Small shapes implied by HPKAN(dim, len) acting on (batch, len, dim).
    B, L, D = 2, 8, 32
    degree, alpha, beta, N = 3, 1.0, 1.0, 7.0

    key = jax.random.PRNGKey(0)
    kx, kw1, kw2 = jax.random.split(key, 3)

    x = jax.random.normal(kx, (B, L, D), dtype=jnp.float32)
    # nn.init.normal_(coeffs, mean=0, std=1/(input_dim*(degree+1)))
    intra_coeffs = jax.random.normal(kw1, (D, D, degree + 1), jnp.float32) \
        * (1.0 / (D * (degree + 1)))
    inter_coeffs = jax.random.normal(kw2, (L, L, degree + 1), jnp.float32) \
        * (1.0 / (L * (degree + 1)))

    fwd = jax.jit(functools.partial(hpkan_forward, degree=degree, alpha=alpha,
                                    beta=beta, N=N))
    out = jax.block_until_ready(fwd(x, intra_coeffs, inter_coeffs))

    ref = jax.block_until_ready(
        _hpkan_ref(x, intra_coeffs, inter_coeffs,
                   degree=degree, alpha=alpha, beta=beta, N=N))

    assert out.shape == (B, L, D)
    # bf16 MXU operands vs. f32 reference -> bf16-appropriate tolerance.
    err = float(jnp.max(jnp.abs(out - ref)))
    assert jnp.allclose(out, ref, atol=2e-2, rtol=2e-2), err
    print("KERNEL_OK")
</pallas_src>

<mosaic_0001>
module attributes {stable_mosaic.version = 11 : i64} {
  func.func @_hpkan_kernel(%arg0: i32, %arg1: memref<8x2x32xf32, #tpu.memory_space<vmem>>, %arg2: memref<128x32xbf16, #tpu.memory_space<vmem>>, %arg3: memref<8x32xbf16, #tpu.memory_space<vmem>>, %arg4: memref<8x64xf32, #tpu.memory_space<vmem>>, %arg5: memref<16x128xbf16, #tpu.memory_space<vmem>>, %arg6: memref<8x64xf32, #tpu.memory_space<vmem>>, %arg7: memref<32x64xbf16, #tpu.memory_space<vmem>>) attributes {dimension_semantics = [#tpu.dimension_semantics<parallel>], iteration_bounds = array<i64: 1>, scalar_prefetch = 0 : i64, scratch_operands = 3 : i64, tpu.core_type = #tpu.core_type<tc>, window_params = [{transform_indices = @transform_0, window_bounds = array<i64: 8, 2, 32>}, {pipeline_mode = #tpu.pipeline_mode<synchronous>, transform_indices = @transform_1, window_bounds = array<i64: 128, 32>}, {pipeline_mode = #tpu.pipeline_mode<synchronous>, transform_indices = @transform_2, window_bounds = array<i64: 8, 32>}, {transform_indices = @transform_3, window_bounds = array<i64: 8, 64>}]} {
    %c0 = arith.constant 0 : index
    %c0_0 = arith.constant 0 : index
    %c0_1 = arith.constant 0 : index
    %0 = vector.load %arg1[%c0, %c0_0, %c0_1] : memref<8x2x32xf32, #tpu.memory_space<vmem>>, vector<8x2x32xf32>
    %1 = vector.shape_cast %0 : vector<8x2x32xf32> to vector<16x32xf32>
    %2 = math.tanh %1 : vector<16x32xf32>
    %cst = arith.constant 1.000000e+00 : f32
    %3 = vector.broadcast %cst : f32 to vector<16x32xf32>
    %4 = arith.truncf %3 : vector<16x32xf32> to vector<16x32xbf16>
    %c0_2 = arith.constant 0 : index
    %c0_3 = arith.constant 0 : index
    %5 = vector.load %arg5[%c0_2, %c0_3] : memref<16x128xbf16, #tpu.memory_space<vmem>>, vector<16x32xbf16>
    tpu.vector_store %arg5[%c0_2, %c0_3], %4 {strides = array<i32>} : memref<16x128xbf16, #tpu.memory_space<vmem>>, vector<16x32xbf16>,
    %cst_4 = arith.constant 0.285714298 : f32
    %6 = vector.broadcast %cst_4 : f32 to vector<16x32xf32>
    %7 = arith.mulf %6, %2 : vector<16x32xf32>
    %cst_5 = arith.constant 1.000000e+00 : f32
    %8 = vector.broadcast %cst_5 : f32 to vector<16x32xf32>
    %9 = arith.subf %8, %7 : vector<16x32xf32>
    %10 = arith.truncf %9 : vector<16x32xf32> to vector<16x32xbf16>
    %c0_6 = arith.constant 0 : index
    %c32 = arith.constant 32 : index
    %11 = vector.load %arg5[%c0_6, %c32] : memref<16x128xbf16, #tpu.memory_space<vmem>>, vector<16x32xbf16>
    tpu.vector_store %arg5[%c0_6, %c32], %10 {strides = array<i32>} : memref<16x128xbf16, #tpu.memory_space<vmem>>, vector<16x32xbf16>,
    %cst_7 = arith.constant 0.416666657 : f32
    %12 = vector.broadcast %cst_7 : f32 to vector<16x32xf32>
    %13 = arith.mulf %12, %2 : vector<16x32xf32>
    %cst_8 = arith.constant 1.45833337 : f32
    %14 = vector.broadcast %cst_8 : f32 to vector<16x32xf32>
    %15 = arith.subf %14, %13 : vector<16x32xf32>
    %16 = arith.mulf %15, %9 : vector<16x32xf32>
    %cst_9 = arith.constant 0.458333343 : f32
    %17 = vector.broadcast %cst_9 : f32 to vector<16x32xf32>
    %18 = arith.mulf %17, %3 : vector<16x32xf32>
    %19 = arith.subf %16, %18 : vector<16x32xf32>
    %20 = arith.truncf %19 : vector<16x32xf32> to vector<16x32xbf16>
    %c0_10 = arith.constant 0 : index
    %c64 = arith.constant 64 : index
    %21 = vector.load %arg5[%c0_10, %c64] : memref<16x128xbf16, #tpu.memory_space<vmem>>, vector<16x32xbf16>
    tpu.vector_store %arg5[%c0_10, %c64], %20 {strides = array<i32>} : memref<16x128xbf16, #tpu.memory_space<vmem>>, vector<16x32xbf16>,
    %cst_11 = arith.constant 5.600000e-01 : f32
    %22 = vector.broadcast %cst_11 : f32 to vector<16x32xf32>
    %23 = arith.mulf %22, %2 : vector<16x32xf32>
    %cst_12 = arith.constant 1.960000e+00 : f32
    %24 = vector.broadcast %cst_12 : f32 to vector<16x32xf32>
    %25 = arith.subf %24, %23 : vector<16x32xf32>
    %26 = arith.mulf %25, %19 : vector<16x32xf32>
    %cst_13 = arith.constant 0.959999978 : f32
    %27 = vector.broadcast %cst_13 : f32 to vector<16x32xf32>
    %28 = arith.mulf %27, %9 : vector<16x32xf32>
    %29 = arith.subf %26, %28 : vector<16x32xf32>
    %30 = arith.truncf %29 : vector<16x32xf32> to vector<16x32xbf16>
    %c0_14 = arith.constant 0 : index
    %c96 = arith.constant 96 : index
    %31 = vector.load %arg5[%c0_14, %c96] : memref<16x128xbf16, #tpu.memory_space<vmem>>, vector<16x32xbf16>
    tpu.vector_store %arg5[%c0_14, %c96], %30 {strides = array<i32>} : memref<16x128xbf16, #tpu.memory_space<vmem>>, vector<16x32xbf16>,
    %c0_15 = arith.constant 0 : index
    %c0_16 = arith.constant 0 : index
    %32 = vector.load %arg5[%c0_15, %c0_16] : memref<16x128xbf16, #tpu.memory_space<vmem>>, vector<16x128xbf16>
    %c0_17 = arith.constant 0 : index
    %c0_18 = arith.constant 0 : index
    %33 = vector.load %arg2[%c0_17, %c0_18] : memref<128x32xbf16, #tpu.memory_space<vmem>>, vector<128x32xbf16>
    %cst_19 = arith.constant dense<0.000000e+00> : vector<16x32xf32>
    %34 = tpu.matmul %32, %33, %cst_19 {dimension_numbers = #tpu.dot_dimension_numbers<[1], [0], [0], [1], [0, 0, 1, 1], [], []>} : vector<16x128xbf16>, vector<128x32xbf16>, vector<16x32xf32> -> vector<16x32xf32>
    %35 = math.tanh %34 : vector<16x32xf32>
    %36 = vector.shape_cast %35 : vector<16x32xf32> to vector<8x2x32xf32>
    %37 = vector.extract_strided_slice %36 {offsets = [0, 0, 0], sizes = [8, 1, 32], strides = [1, 1, 1]} : vector<8x2x32xf32> to vector<8x1x32xf32>
    %38 = vector.shape_cast %37 : vector<8x1x32xf32> to vector<8x32xf32>
    %c0_20 = arith.constant 0 : index
    %c0_21 = arith.constant 0 : index
    %39 = vector.load %arg6[%c0_20, %c0_21] : memref<8x64xf32, #tpu.memory_space<vmem>>, vector<8x32xf32>
    tpu.vector_store %arg6[%c0_20, %c0_21], %38 {strides = array<i32>} : memref<8x64xf32, #tpu.memory_space<vmem>>, vector<8x32xf32>,
    %40 = vector.extract_strided_slice %36 {offsets = [0, 1, 0], sizes = [8, 1, 32], strides = [1, 1, 1]} : vector<8x2x32xf32> to vector<8x1x32xf32>
    %41 = vector.shape_cast %40 : vector<8x1x32xf32> to vector<8x32xf32>
    %c0_22 = arith.constant 0 : index
    %c32_23 = arith.constant 32 : index
    %42 = vector.load %arg6[%c0_22, %c32_23] : memref<8x64xf32, #tpu.memory_space<vmem>>, vector<8x32xf32>
    tpu.vector_store %arg6[%c0_22, %c32_23], %41 {strides = array<i32>} : memref<8x64xf32, #tpu.memory_space<vmem>>, vector<8x32xf32>,
    %c0_24 = arith.constant 0 : index
    %c0_25 = arith.constant 0 : index
    %43 = vector.load %arg6[%c0_24, %c0_25] : memref<8x64xf32, #tpu.memory_space<vmem>>, vector<8x64xf32>
    %cst_26 = arith.constant 1.000000e+00 : f32
    %44 = vector.broadcast %cst_26 : f32 to vector<8x64xf32>
    %45 = arith.truncf %44 : vector<8x64xf32> to vector<8x64xbf16>
    %c0_27 = arith.constant 0 : index
    %c0_28 = arith.constant 0 : index
    %46 = vector.load %arg7[%c0_27, %c0_28] : memref<32x64xbf16, #tpu.memory_space<vmem>>, vector<8x64xbf16>
    tpu.vector_store %arg7[%c0_27, %c0_28], %45 {strides = array<i32>} : memref<32x64xbf16, #tpu.memory_space<vmem>>, vector<8x64xbf16>,
    %cst_29 = arith.constant 0.285714298 : f32
    %47 = vector.broadcast %cst_29 : f32 to vector<8x64xf32>
    %48 = arith.mulf %47, %43 : vector<8x64xf32>
    %cst_30 = arith.constant 1.000000e+00 : f32
    %49 = vector.broadcast %cst_30 : f32 to vector<8x64xf32>
    %50 = arith.subf %49, %48 : vector<8x64xf32>
    %51 = arith.truncf %50 : vector<8x64xf32> to vector<8x64xbf16>
    %c8 = arith.constant 8 : index
    %c0_31 = arith.constant 0 : index
    %52 = vector.load %arg7[%c8, %c0_31] : memref<32x64xbf16, #tpu.memory_space<vmem>>, vector<8x64xbf16>
    tpu.vector_store %arg7[%c8, %c0_31], %51 {strides = array<i32>} : memref<32x64xbf16, #tpu.memory_space<vmem>>, vector<8x64xbf16>,
    %cst_32 = arith.constant 0.416666657 : f32
    %53 = vector.broadcast %cst_32 : f32 to vector<8x64xf32>
    %54 = arith.mulf %53, %43 : vector<8x64xf32>
    %cst_33 = arith.constant 1.45833337 : f32
    %55 = vector.broadcast %cst_33 : f32 to vector<8x64xf32>
    %56 = arith.subf %55, %54 : vector<8x64xf32>
    %57 = arith.mulf %56, %50 : vector<8x64xf32>
    %cst_34 = arith.constant 0.458333343 : f32
    %58 = vector.broadcast %cst_34 : f32 to vector<8x64xf32>
    %59 = arith.mulf %58, %44 : vector<8x64xf32>
    %60 = arith.subf %57, %59 : vector<8x64xf32>
    %61 = arith.truncf %60 : vector<8x64xf32> to vector<8x64xbf16>
    %c16 = arith.constant 16 : index
    %c0_35 = arith.constant 0 : index
    %62 = vector.load %arg7[%c16, %c0_35] : memref<32x64xbf16, #tpu.memory_space<vmem>>, vector<8x64xbf16>
    tpu.vector_store %arg7[%c16, %c0_35], %61 {strides = array<i32>} : memref<32x64xbf16, #tpu.memory_space<vmem>>, vector<8x64xbf16>,
    %cst_36 = arith.constant 5.600000e-01 : f32
    %63 = vector.broadcast %cst_36 : f32 to vector<8x64xf32>
    %64 = arith.mulf %63, %43 : vector<8x64xf32>
    %cst_37 = arith.constant 1.960000e+00 : f32
    %65 = vector.broadcast %cst_37 : f32 to vector<8x64xf32>
    %66 = arith.subf %65, %64 : vector<8x64xf32>
    %67 = arith.mulf %66, %60 : vector<8x64xf32>
    %cst_38 = arith.constant 0.959999978 : f32
    %68 = vector.broadcast %cst_38 : f32 to vector<8x64xf32>
    %69 = arith.mulf %68, %50 : vector<8x64xf32>
    %70 = arith.subf %67, %69 : vector<8x64xf32>
    %71 = arith.truncf %70 : vector<8x64xf32> to vector<8x64xbf16>
    %c24 = arith.constant 24 : index
    %c0_39 = arith.constant 0 : index
    %72 = vector.load %arg7[%c24, %c0_39] : memref<32x64xbf16, #tpu.memory_space<vmem>>, vector<8x64xbf16>
    tpu.vector_store %arg7[%c24, %c0_39], %71 {strides = array<i32>} : memref<32x64xbf16, #tpu.memory_space<vmem>>, vector<8x64xbf16>,
    %c0_40 = arith.constant 0 : index
    %c0_41 = arith.constant 0 : index
    %73 = vector.load %arg3[%c0_40, %c0_41] : memref<8x32xbf16, #tpu.memory_space<vmem>>, vector<8x32xbf16>
    %c0_42 = arith.constant 0 : index
    %c0_43 = arith.constant 0 : index
    %74 = vector.load %arg7[%c0_42, %c0_43] : memref<32x64xbf16, #tpu.memory_space<vmem>>, vector<32x64xbf16>
    %cst_44 = arith.constant dense<0.000000e+00> : vector<8x64xf32>
    %75 = tpu.matmul %73, %74, %cst_44 {dimension_numbers = #tpu.dot_dimension_numbers<[1], [0], [0], [1], [0, 0, 1, 1], [], []>} : vector<8x32xbf16>, vector<32x64xbf16>, vector<8x64xf32> -> vector<8x64xf32>
    %c0_45 = arith.constant 0 : index
    %c0_46 = arith.constant 0 : index
    %76 = vector.load %arg4[%c0_45, %c0_46] : memref<8x64xf32, #tpu.memory_space<vmem>>, vector<8x64xf32>
    tpu.vector_store %arg4[%c0_45, %c0_46], %75 {strides = array<i32>} : memref<8x64xf32, #tpu.memory_space<vmem>>, vector<8x64xf32>,
    return
  }
  func.func @transform_0(%arg0: i32) -> (i32, i32, i32) {
    %c0_i32 = arith.constant 0 : i32
    %c0_i32_0 = arith.constant 0 : i32
    %c0_i32_1 = arith.constant 0 : i32
    return %c0_i32, %arg0, %c0_i32_0 : i32, i32, i32
  }
  func.func @transform_1(%arg0: i32) -> (i32, i32) {
    %c0_i32 = arith.constant 0 : i32
    %c0_i32_0 = arith.constant 0 : i32
    %c0_i32_1 = arith.constant 0 : i32
    return %c0_i32, %c0_i32_0 : i32, i32
  }
  func.func @transform_2(%arg0: i32) -> (i32, i32) {
    %c0_i32 = arith.constant 0 : i32
    %c0_i32_0 = arith.constant 0 : i32
    %c0_i32_1 = arith.constant 0 : i32
    return %c0_i32, %c0_i32_0 : i32, i32
  }
  func.func @transform_3(%arg0: i32) -> (i32, i32) {
    %c0_i32 = arith.constant 0 : i32
    %c0_i32_0 = arith.constant 0 : i32
    return %c0_i32, %arg0 : i32, i32
  }
}

</mosaic_0001>

<bundles_post_ra>
// kernel: hpkan_forward.1
= control target key start
LH: loop header
LB: loop body
LE: loop exit
PB: predicated region body
PF: predicated region fallthrough
CT: control target
= control target key end

     0   :  { %s537_s5 = smov 64   ;;  %vm32_vm0 = vcmask 257024   ;;  %vm389_vm1 = vcmask 519168   ;;  %s539_s8 = smov 96   ;;  %vm88_vm2 = vcmask 519424   ;;  %vm160_vm3 = vcmask 781824   ;;  %s666_s0 = inlined_call_operand.vmem [shape: f32[8,2,32], index: 0, kind: input, shape index: {}]   ;;  %s667_s1 = inlined_call_operand.vmem [shape: bf16[128,32], index: 1, kind: input, shape index: {}]   ;;  %s668_s2 = inlined_call_operand.vmem [shape: bf16[8,32], index: 2, kind: input, shape index: {}]   ;;  %s669_s3 = inlined_call_operand.vmem [shape: f32[8,64], index: 3, kind: output, shape index: {}]  }
   0x1   :  { %v16_v0 = vld [vmem:[%s666_s0] sm:$0x3]  ;;  %v17_v1 = vld [vmem:[%s666_s0 + $0x2] sm:$0x3]  ;;  %v18_v2 = vld [vmem:[%s666_s0 + $0x4] sm:$0x3] }
   0x2   :  { %v19_v3 = vld [vmem:[%s666_s0 + $0x6] sm:$0x3]  ;;  %516 = vtanh.f32 %v16_v0  ;;  %v20_v5 = vld [vmem:[%s666_s0 + $0x8] sm:$0x3]  ;;  %v21_v6 = vld [vmem:[%s666_s0 + $0xa] sm:$0x3] }
   0x3   :  { %518 = vtanh.f32 %v17_v1  ;;  %v22_v7 = vld [vmem:[%s666_s0 + $0xc] sm:$0x3]  ;;  %v23_v12 = vld [vmem:[%s666_s0 + $0xe] sm:$0x3]  ;;  %s536_s0 = smov 32   ;;  %vm240_vm4 = vcmask 1044224  }
   0x4   :  { %520 = vtanh.f32 %v18_v2  ;;  %vm349_vm5 = vcmask 1042434   ;;  %vm347_vm6 = vcmask 1041409   ;;  %vm351_vm7 = vcmask 1043459  }
   0x5   :  { %522 = vtanh.f32 %v19_v3  ;;  %vm353_vm8 = vcmask 1044484   ;;  %vm355_vm9 = vcmask 1045509   ;;  %vm357_vm10 = vcmask 1046534  }
   0x6   :  { %524 = vtanh.f32 %v20_v5  ;;  %vm359_vm11 = vcmask 1047559   ;;  %vm362_vm12 = vcmask 261120   ;;  %vm386_vm13 = vcmask 516352  }
   0x7   :  { %526 = vtanh.f32 %v21_v6  ;;  %vm384_vm14 = vcmask 523521   ;;  %vm441_vm15 = vcmask 523264  }
   0x8   :  { %v517_v4 = vpop.eup %516  ;;  %528 = vtanh.f32 %v22_v7 }
   0x9   :  { %v519_v8 = vpop.eup %518  ;;  %v35_v9 = vmul.f32 0.2857143, %v517_v4  ;;  %v91_v10 = vmul.f32 0.41666666, %v517_v4  ;;  %v581_v11 = vmul.f32 0.56, %v517_v4  ;;  %530 = vtanh.f32 %v23_v12 }
   0xa   :  { %v521_v13 = vpop.eup %520  ;;  %v36_v14 = vmul.f32 0.2857143, %v519_v8  ;;  %v92_v15 = vmul.f32 0.41666666, %v519_v8  ;;  %v586_v16 = vmul.f32 0.56, %v519_v8 }
   0xb   :  { %v523_v17 = vpop.eup %522  ;;  %v37_v18 = vmul.f32 0.2857143, %v521_v13  ;;  %v43_v19 = vsub.f32 1.0, %v35_v9  ;;  %v93_v20 = vmul.f32 0.41666666, %v521_v13 }
   0xc   :  { %v38_v21 = vmul.f32 0.2857143, %v523_v17  ;;  %v44_v22 = vsub.f32 1.0, %v36_v14  ;;  %v94_v23 = vmul.f32 0.41666666, %v523_v17  ;;  %v525_v33 = vpop.eup %524 }
   0xd   :  { %v45_v24 = vsub.f32 1.0, %v37_v18  ;;  %59 = vst [vmem:[#allocation1] ss:$4 sm:$0xff] %v43_v19  ;;  %v99_v25 = vsub.f32 1.4583334, %v91_v10  ;;  %v527_v37 = vpop.eup %526 }
   0xe   :  { %v46_v26 = vsub.f32 1.0, %v38_v21  ;;  %61 = vst [vmem:[#allocation1 + $0x1] ss:$4 sm:$0xff] %v44_v22  ;;  %v100_v27 = vsub.f32 1.4583334, %v92_v15  ;;  %v529_v39 = vpop.eup %528 }
   0xf   :  { %63 = vst [vmem:[#allocation1 + $0x2] ss:$4 sm:$0xff] %v45_v24  ;;  %v101_v28 = vsub.f32 1.4583334, %v93_v20  ;;  %v102_v29 = vsub.f32 1.4583334, %v94_v23  ;;  %v107_v30 = vmul.f32 %v99_v25, %v43_v19  ;;  %v531_v43 = vpop.eup %530 }
  0x10   :  { %65 = vst [vmem:[#allocation1 + $0x3] ss:$4 sm:$0xff] %v46_v26  ;;  %v108_v31 = vmul.f32 %v100_v27, %v44_v22  ;;  %v165_v32 = vmul.f32 0.56, %v521_v13  ;;  %v166_v36 = vmul.f32 0.56, %v523_v17 }
  0x11   :  { %v109_v34 = vmul.f32 %v101_v28, %v45_v24  ;;  %v110_v35 = vmul.f32 %v102_v29, %v46_v26  ;;  %v447_v38 = vadd.f32 -0.45833334, %v107_v30  ;;  %v171_v41 = vsub.f32 1.96, %v581_v11  ;;  %v509_v23 = vld [vmem:[%s667_s1 + $0x38] sm:$0xff]  ;;  %v508_v28 = vld [vmem:[%s667_s1 + $0x30] sm:$0xff] }
  0x12   :  { %v448_v40 = vadd.f32 -0.45833334, %v108_v31  ;;  %v172_v42 = vsub.f32 1.96, %v586_v16  ;;  %v173_v46 = vsub.f32 1.96, %v165_v32  ;;  %315 = vmatpush.bf16.msra.mxu0 %v509_v23 }
  0x13   :  { %v449_v44 = vadd.f32 -0.45833334, %v109_v34  ;;  %v450_v45 = vadd.f32 -0.45833334, %v110_v35  ;;  %v174_v47 = vsub.f32 1.96, %v166_v36  ;;  %v179_v0 = vmul.f32 %v447_v38, %v171_v41 }
  0x14   :  { %v187_v48 = vmul.f32 0.96, %v43_v19  ;;  %v39_v49 = vmul.f32 0.2857143, %v525_v33  ;;  %v188_v50 = vmul.f32 0.96, %v44_v22  ;;  %v180_v3 = vmul.f32 %v448_v40, %v172_v42 }
  0x15   :  { %v40_v51 = vmul.f32 0.2857143, %v527_v37  ;;  %v41_v52 = vmul.f32 0.2857143, %v529_v39  ;;  %v42_v54 = vmul.f32 0.2857143, %v531_v43  ;;  %v181_v4 = vmul.f32 %v449_v44, %v173_v46 }
  0x16   :  { %v590_v56 = vsub.f32 1.0, %v39_v49  ;;  %v95_v58 = vmul.f32 0.41666666, %v525_v33  ;;  %v96_v61 = vmul.f32 0.41666666, %v527_v37  ;;  %v182_v8 = vmul.f32 %v450_v45, %v174_v47  ;;  %316 = vmatpush.bf16.msra.mxu0 %v508_v28  ;;  %v507_v35 = vld [vmem:[%s667_s1 + $0x28] sm:$0xff] }
  0x17   :  { %v74_v53 = vld.sshfl [vmem:[#allocation1] sm:$0xff pattern:$0x73625140]  ;;  %v592_v57 = vsub.f32 1.0, %v40_v51  ;;  %v594_v59 = vsub.f32 1.0, %v41_v52  ;;  %v596_v60 = vsub.f32 1.0, %v42_v54  ;;  %v195_v10 = vsub.f32 %v179_v0, %v187_v48 }
  0x18   :  { %v78_v55 = vpack.c.bf16 %v74_v53, %v74_v53  ;;  %131 = vst [vmem:[#allocation1] ss:$4 sm:$0xff] %v447_v38  ;;  %v97_v62 = vmul.f32 0.41666666, %v529_v39  ;;  %v98_v63 = vmul.f32 0.41666666, %v531_v43  ;;  %v196_v13 = vsub.f32 %v180_v3, %v188_v50 }
  0x19   :  { %133 = vst [vmem:[#allocation1 + $0x1] ss:$4 sm:$0xff] %v448_v40  ;;  %v103_v1 = vsub.f32 1.4583334, %v95_v58  ;;  %v104_v2 = vsub.f32 1.4583334, %v96_v61 }
  0x1a   :  { %82 = vrot.lane.b32.xlu0 %v78_v55, %s536_s0  ;;  %135 = vst [vmem:[#allocation1 + $0x2] ss:$4 sm:$0xff] %v449_v44  ;;  %v189_v5 = vmul.f32 0.96, %v45_v24  ;;  %v105_v6 = vsub.f32 1.4583334, %v97_v62  ;;  %317 = vmatpush.bf16.msra.mxu0 %v507_v35 }
  0x1b   :  { %137 = vst [vmem:[#allocation1 + $0x3] ss:$4 sm:$0xff] %v450_v45  ;;  %v106_v7 = vsub.f32 1.4583334, %v98_v63  ;;  %v190_v9 = vmul.f32 0.96, %v46_v26  ;;  %v111_v11 = vmul.f32 %v103_v1, %v590_v56  ;;  %v112_v12 = vmul.f32 %v104_v2, %v592_v57 }
  0x1c   :  { %67 = vst [vmem:[#allocation1 + $0x20] ss:$4 sm:$0xff] %v590_v56  ;;  %v197_v14 = vsub.f32 %v181_v4, %v189_v5  ;;  %v113_v15 = vmul.f32 %v105_v6, %v594_v59  ;;  %v167_v17 = vmul.f32 0.56, %v525_v33  ;;  %v168_v18 = vmul.f32 0.56, %v527_v37 }
  0x1d   :  { %69 = vst [vmem:[#allocation1 + $0x21] ss:$4 sm:$0xff] %v592_v57  ;;  %v114_v16 = vmul.f32 %v106_v7, %v596_v60  ;;  %v169_v19 = vmul.f32 0.56, %v529_v39  ;;  %v198_v21 = vsub.f32 %v182_v8, %v190_v9  ;;  %v170_v22 = vmul.f32 0.56, %v531_v43 }
  0x1e   :  { %71 = vst [vmem:[#allocation1 + $0x22] ss:$4 sm:$0xff] %v594_v59  ;;  %v451_v25 = vadd.f32 -0.45833334, %v111_v11  ;;  %v452_v26 = vadd.f32 -0.45833334, %v112_v12 }
  0x1f   :  { %73 = vst [vmem:[#allocation1 + $0x23] ss:$4 sm:$0xff] %v596_v60  ;;  %v453_v27 = vadd.f32 -0.45833334, %v113_v15  ;;  %v454_v29 = vadd.f32 -0.45833334, %v114_v16 }
  0x20   :  { %v175_v30 = vsub.f32 1.96, %v167_v17  ;;  %v176_v33 = vsub.f32 1.96, %v168_v18  ;;  %v177_v34 = vsub.f32 1.96, %v169_v19 }
  0x21   :  { %v178_v36 = vsub.f32 1.96, %v170_v22  ;;  %v191_v38 = vmul.f32 0.96, %v590_v56  ;;  %v192_v40 = vmul.f32 0.96, %v592_v57 }
  0x22   :  { %v146_v20 = vld.sshfl [vmem:[#allocation1] sm:$0xff pattern:$0x73625140]  ;;  %v183_v37 = vmul.f32 %v451_v25, %v175_v30  ;;  %v184_v39 = vmul.f32 %v452_v26, %v176_v33  ;;  %v538_v41 = vmov 1065369472   ;;  %v185_v42 = vmul.f32 %v453_v27, %v177_v34  ;;  %v505_v57 = vld [vmem:[%s667_s1 + $0x18] sm:$0xff] }
  0x23   :  { %v150_v24 = vpack.c.bf16 %v146_v20, %v146_v20  ;;  %211 = vst [vmem:[#allocation1] ss:$4 sm:$0xff] %v195_v10  ;;  %v193_v43 = vmul.f32 0.96, %v594_v59  ;;  %v194_v44 = vmul.f32 0.96, %v596_v60  ;;  %v186_v45 = vmul.f32 %v454_v29, %v178_v36 }
  0x24   :  { %213 = vst [vmem:[#allocation1 + $0x1] ss:$4 sm:$0xff] %v196_v13  ;;  %v199_v47 = vsub.f32 %v183_v37, %v191_v38  ;;  %v200_v49 = vsub.f32 %v184_v39, %v192_v40  ;;  %v506_v56 = vld [vmem:[%s667_s1 + $0x20] sm:$0xff]  ;;  %v504_v58 = vld [vmem:[%s667_s1 + $0x10] sm:$0xff]  ;;  %v503_v59 = vld [vmem:[%s667_s1 + $0x8] sm:$0xff] }
  0x25   :  { %215 = vst [vmem:[#allocation1 + $0x2] ss:$4 sm:$0xff] %v197_v14  ;;  %154 = vrot.lane.b32.xlu1 %v150_v24, %s537_s5  ;;  %v201_v50 = vsub.f32 %v185_v42, %v193_v43  ;;  %v202_v52 = vsub.f32 %v186_v45, %v194_v44  ;;  %318 = vmatpush.bf16.msra.mxu0 %v506_v56  ;;  %v502_v60 = vld [vmem:[%s667_s1] sm:$0xff] }
  0x26   :  { %217 = vst [vmem:[#allocation1 + $0x3] ss:$4 sm:$0xff] %v198_v21  ;;  %v75_v31 = vld.sshfl [vmem:[#allocation1 + $0x20] sm:$0xff pattern:$0x73625140] }
  0x27   :  { %v79_v32 = vpack.c.bf16 %v75_v31, %v75_v31  ;;  %139 = vst [vmem:[#allocation1 + $0x20] ss:$4 sm:$0xff] %v451_v25 }
  0x28   :  { %141 = vst [vmem:[#allocation1 + $0x21] ss:$4 sm:$0xff] %v452_v26 }
  0x29   :  { %84 = vrot.lane.b32.xlu0 %v79_v32, %s536_s0  ;;  %143 = vst [vmem:[#allocation1 + $0x22] ss:$4 sm:$0xff] %v453_v27  ;;  %319 = vmatpush.bf16.msra.mxu0 %v505_v57 }
  0x2a   :  { %145 = vst [vmem:[#allocation1 + $0x23] ss:$4 sm:$0xff] %v454_v29 }
  0x2b   :  { %33 = vst.msk [vmem:[#allocation2] sm:$0xf] %vm32_vm0, %v538_v41 }
  0x2c   :  { %390 = vst.msk [vmem:[#allocation4] sm:$0xf] %vm389_vm1, %v538_v41 }
  0x2d   :  { %v226_v46 = vld.sshfl [vmem:[#allocation1] sm:$0xff pattern:$0x73625140]  ;;  %34 = vst.msk [vmem:[#allocation2 + $0x4] sm:$0xf] %vm32_vm0, %v538_v41  ;;  %320 = vmatpush.bf16.msra.mxu0 %v504_v58 }
  0x2e   :  { %v230_v48 = vpack.c.bf16 %v226_v46, %v226_v46 }
  0x30   :  { %234 = vrot.lane.b32.xlu2 %v230_v48, %s539_s8 }
  0x31   :  { %v147_v51 = vld.sshfl [vmem:[#allocation1 + $0x20] sm:$0xff pattern:$0x73625140]  ;;  %321 = vmatpush.bf16.msra.mxu0 %v503_v59 }
  0x32   :  { %v151_v53 = vpack.c.bf16 %v147_v51, %v147_v51  ;;  %219 = vst [vmem:[#allocation1 + $0x20] ss:$4 sm:$0xff] %v199_v47 }
  0x33   :  { %221 = vst [vmem:[#allocation1 + $0x21] ss:$4 sm:$0xff] %v200_v49 }
  0x34   :  { %223 = vst [vmem:[#allocation1 + $0x22] ss:$4 sm:$0xff] %v201_v50  ;;  %156 = vrot.lane.b32.xlu1 %v151_v53, %s537_s5 }
  0x35   :  { %225 = vst [vmem:[#allocation1 + $0x23] ss:$4 sm:$0xff] %v202_v52  ;;  %322 = vmatpush.bf16.msra.mxu0 %v502_v60 }
  0x3c   :  { %v227_v54 = vld.sshfl [vmem:[#allocation1 + $0x20] sm:$0xff pattern:$0x73625140] }
  0x3d   :  { %v231_v55 = vpack.c.bf16 %v227_v54, %v227_v54 }
  0x3f   :  { %236 = vrot.lane.b32.xlu2 %v231_v55, %s539_s8 }
  0x8a   :  { %v235_v62 = vpop.permute.xlu2 %234 }
  0x8c   :  { %v83_v61 = vpop.permute.xlu0 %82 }
  0x8d   :  { %89 = vst.msk [vmem:[#allocation2] sm:$0xf] %vm88_vm2, %v83_v61 }
  0x97   :  { %v155_v63 = vpop.permute.xlu1 %154 }
  0x98   :  { %161 = vst.msk [vmem:[#allocation2] sm:$0xf] %vm160_vm3, %v155_v63 }
  0x99   :  { %241 = vst.msk [vmem:[#allocation2] sm:$0xf] %vm240_vm4, %v235_v62  ;;  %v237_v1 = vpop.permute.xlu2 %236  ;;  %v408_v62 = vld [vmem:[%s668_s2] sm:$0xf] }
  0x9b   :  { %v85_v0 = vpop.permute.xlu0 %84 }
  0x9c   :  { %90 = vst.msk [vmem:[#allocation2 + $0x4] sm:$0xf] %vm88_vm2, %v85_v0 }
  0xa6   :  { %v157_v2 = vpop.permute.xlu1 %156 }
  0xa7   :  { %162 = vst.msk [vmem:[#allocation2 + $0x4] sm:$0xf] %vm160_vm3, %v157_v2 }
  0xa8   :  { %242 = vst.msk [vmem:[#allocation2 + $0x4] sm:$0xf] %vm240_vm4, %v237_v1 }
  0xaf   :  { %v501_v3 = vld [vmem:[#allocation2] sm:$0xff] }
  0xb0   :  { %323 = vmatmul.bf16.vlgmr.msra.gmra.mxu0 %v501_v3 }
 0x12d   :  { %v324_v4 = vpop.f32.mrf.mxu0 }
 0x12e   :  { %532 = vtanh.f32 %v324_v4 }
 0x134   :  { %v533_v5 = vpop.eup %532 }
 0x135   :  { %v326_v6 = vpop.f32.mrf.mxu0  ;;  %v333_v7 = vrot.slane %v533_v5, 2  ;;  %v334_v8 = vrot.slane %v533_v5, 4  ;;  %v364_v10 = vperm.slane %v533_v5, 1  ;;  %v339_v12 = vperm.slane %v533_v5, 0 }
 0x136   :  { %534 = vtanh.f32 %v326_v6  ;;  %v335_v13 = vrot.slane %v533_v5, 6 }
 0x137   :  { %v340_v9 = vperm.slane %v333_v7, 0  ;;  %v365_v11 = vperm.slane %v333_v7, 1  ;;  %v341_v14 = vperm.slane %v334_v8, 0  ;;  %v366_v15 = vperm.slane %v334_v8, 1 }
 0x138   :  { %v342_v20 = vperm.slane %v335_v13, 0  ;;  %v367_v21 = vperm.slane %v335_v13, 1 }
 0x139   :  { %v372_v16 = vsel %vm349_vm5, %v365_v11, %v364_v10  ;;  %v348_v17 = vsel %vm347_vm6, %v340_v9, %v339_v12 }
 0x13a   :  { %v373_v18 = vsel %vm351_vm7, %v366_v15, %v372_v16  ;;  %v350_v22 = vsel %vm349_vm5, %v341_v14, %v348_v17 }
 0x13b   :  { %v374_v27 = vsel %vm353_vm8, %v367_v21, %v373_v18  ;;  %v352_v32 = vsel %vm351_vm7, %v342_v20, %v350_v22 }
 0x13c   :  { %v535_v19 = vpop.eup %534 }
 0x13d   :  { %v338_v23 = vrot.slane %v535_v19, 6  ;;  %v336_v24 = vrot.slane %v535_v19, 2  ;;  %v337_v25 = vrot.slane %v535_v19, 4  ;;  %v368_v26 = vperm.slane %v535_v19, 1 }
 0x13e   :  { %v343_v28 = vperm.slane %v535_v19, 0 }
 0x13f   :  { %v371_v29 = vperm.slane %v338_v23, 1  ;;  %v345_v30 = vperm.slane %v337_v25, 0  ;;  %v369_v31 = vperm.slane %v336_v24, 1  ;;  %v370_v33 = vperm.slane %v337_v25, 1 }
 0x140   :  { %v375_v34 = vsel %vm355_vm9, %v368_v26, %v374_v27  ;;  %v344_v35 = vperm.slane %v336_v24, 0  ;;  %v354_v36 = vsel %vm353_vm8, %v343_v28, %v352_v32  ;;  %v346_v38 = vperm.slane %v338_v23, 0 }
 0x141   :  { %380 = vrot.lane.b32.xlu1 %v371_v29, %s536_s0  ;;  %v376_v37 = vsel %vm357_vm10, %v369_v31, %v375_v34 }
 0x142   :  { %v377_v39 = vsel %vm359_vm11, %v370_v33, %v376_v37  ;;  %v356_v40 = vsel %vm355_vm9, %v344_v35, %v354_v36 }
 0x143   :  { %378 = vrot.lane.b32.xlu0 %v377_v39, %s536_s0  ;;  %v358_v41 = vsel %vm357_vm10, %v345_v30, %v356_v40 }
 0x144   :  { %v360_v42 = vsel %vm359_vm11, %v346_v38, %v358_v41 }
 0x145   :  { %363 = vst.msk [vmem:[#allocation3] sm:$0xff] %vm362_vm12, %v360_v42 }
 0x1b3   :  { %v381_v43 = vpop.permute.xlu1 %380 }
 0x1b4   :  { %387 = vst.msk [vmem:[#allocation3 + $0x7] sm:$0x1] %vm386_vm13, %v381_v43 }
 0x1b5   :  { %v379_v44 = vpop.permute.xlu0 %378 }
 0x1b6   :  { %385 = vst.msk [vmem:[#allocation3 - $0x1] sm:$0xfe] %vm384_vm14, %v379_v44 }
 0x1bd   :  { %v388_v45 = vld [vmem:[#allocation3] sm:$0xff] }
 0x1be   :  { %v391_v46 = vmul.f32 0.2857143, %v388_v45  ;;  %v395_v47 = vmul.f32 0.41666666, %v388_v45  ;;  %v401_v50 = vmul.f32 0.56, %v388_v45 }
 0x1c0   :  { %v392_v48 = vsub.f32 1.0, %v391_v46  ;;  %v396_v49 = vsub.f32 1.4583334, %v395_v47  ;;  %v402_v53 = vsub.f32 1.96, %v401_v50 }
 0x1c2   :  { %v397_v51 = vmul.f32 %v396_v49, %v392_v48  ;;  %v393_v52 = vpack.c.bf16 %v392_v48, %v392_v48  ;;  %v404_v57 = vmul.f32 0.96, %v392_v48 }
 0x1c4   :  { %v491_v54 = vadd.f32 -0.45833334, %v397_v51  ;;  %394 = vst.msk [vmem:[#allocation4 + $0x4] sm:$0xf] %vm389_vm1, %v393_v52 }
 0x1c6   :  { %v399_v55 = vpack.c.bf16 %v491_v54, %v491_v54  ;;  %v403_v56 = vmul.f32 %v491_v54, %v402_v53 }
 0x1c8   :  { %400 = vst.msk [vmem:[#allocation4 + $0x8] sm:$0xf] %vm389_vm1, %v399_v55  ;;  %v405_v58 = vsub.f32 %v403_v56, %v404_v57 }
 0x1ca   :  { %v406_v59 = vpack.c.bf16 %v405_v58, %v405_v58 }
 0x1cb   :  { %v510_v61 = vld [vmem:[#allocation4] sm:$0xff] }
 0x1cc   :  { %407 = vst.msk [vmem:[#allocation4 + $0xc] sm:$0xf] %vm389_vm1, %v406_v59 }
 0x1d3   :  { %v511_v60 = vld [vmem:[#allocation4 + $0x8] sm:$0xff] }
 0x1d4   :  { %434 = vmatpush.bf16.msra.mxu1 %v511_v60 }
 0x1d8   :  { %435 = vmatpush.bf16.msra.mxu1 %v510_v61 }
 0x1db   :  { %500 = vmatmul.msk.bf16.vlgmr.msra.gmra.mxu1 %vm362_vm12, %v408_v62 }
 0x258   :  { %v437_v63 = vpop.f32.mrf.mxu1 }
 0x259   :  { %442 = vst.msk [vmem:[%s669_s3] sm:$0xff] %vm441_vm15, %v437_v63 }
 0x260   :  { %v439_v0 = vpop.f32.mrf.mxu1 }

</bundles_post_ra>
